<compile_context>
chip_gen: v7x
topology: tpu7x:2x2x1
jax: 0.10.0
libtpu: 0.0.40
codegen_flags: <defaults>
</compile_context>

<pallas_src>
import functools

import jax
import jax.numpy as jnp
from jax.experimental import pallas as pl
from jax.experimental.pallas import tpu as pltpu

EPS = 1e-5


def _round_up(v, m):
    return (v + m - 1) // m * m


def _vmem_limit_bytes():
    """Generation-aware VMEM budget (leave headroom for compiler scratch)."""
    cap = 128 * 1024 * 1024
    try:
        info = pltpu.get_tpu_info()
        cap = int(getattr(info, "vmem_capacity_bytes", cap))
    except Exception:
        pass
    return min(cap * 3 // 4, 100 * 1024 * 1024)


def _pick_row_tile(n, c_pad, h_pad, row_tile, vmem_budget):
    """Largest row tile (multiple of 16) whose working set fits the budget."""
    tm = min(max(16, _round_up(row_tile, 16)), _round_up(n, 16))
    while tm > 16:
        n_pad = _round_up(n, tm)
        a_tile = 2 * tm * n_pad * 2                       # 2x bf16 A_hat tile
        resident = 2 * (n_pad * c_pad * 2                 # bf16 X_norm
                        + c_pad * h_pad * 2               # bf16 W
                        + h_pad * 4)                      # f32 bias
        outs = 2 * tm * h_pad * 2 + 4 * h_pad * 4         # bf16 h + partials
        if a_tile + resident + outs <= int(vmem_budget * 0.8):
            break
        tm = max(16, (tm // 2) // 16 * 16)
    return tm


# --------------------------------------------------------------------------
# Kernel 1: (A_hat @ X_norm) @ W + b -> ReLU, plus per-tile BN1 partial stats.
# Row axis is independent across tiles -> "parallel" (shards on v7x megacore).
# --------------------------------------------------------------------------
def gcn_main_kernel(a_ref, xn_ref, w_ref, b_ref, h_ref, sum_ref, sq_ref,
                    *, n_nodes):
    i = pl.program_id(0)
    last = pl.num_programs(0) - 1

    # Aggregate first (narrow C_in), then project to hidden. bf16 MXU, f32 acc.
    agg = jnp.dot(a_ref[...], xn_ref[...],                # (TM,Np) x (Np,Cp)
                  preferred_element_type=jnp.float32)
    z = jnp.dot(agg.astype(jnp.bfloat16), w_ref[...],     # (TM,Cp) x (Cp,Hp)
                preferred_element_type=jnp.float32) + b_ref[...]
    h = jnp.maximum(z, 0.0)                               # ReLU (f32)
    h_ref[...] = h.astype(h_ref.dtype)                    # bf16 intermediate

    # Per-tile BN1 partials. Only the last tile can contain padded rows, so
    # only it pays for the iota/compare/select mask.
    @pl.when(i == last)
    def _():
        tm = h.shape[0]
        row = jax.lax.broadcasted_iota(jnp.int32, (tm, 1), 0) + i * tm
        hm = jnp.where(row < n_nodes, h, 0.0)
        sum_ref[...] = jnp.sum(hm, axis=0, keepdims=True)[None]
        sq_ref[...] = jnp.sum(hm * hm, axis=0, keepdims=True)[None]

    @pl.when(i != last)
    def _():
        sum_ref[...] = jnp.sum(h, axis=0, keepdims=True)[None]
        sq_ref[...] = jnp.sum(h * h, axis=0, keepdims=True)[None]


# --------------------------------------------------------------------------
# Kernel 2: apply BN1 with the global stats (independent row tiles -> parallel).
# --------------------------------------------------------------------------
def bn_apply_kernel(h_ref, m_ref, s_ref, o_ref):
    o_ref[...] = (h_ref[...].astype(jnp.float32) - m_ref[...]) * s_ref[...]


# --------------------------------------------------------------------------
# Glue: dense normalized adjacency D^-1/2 (A + I) D^-1/2, built directly into
# the padded bf16 buffer (single scatter, padded rows/cols stay zero).
# Existing self-loops are replaced by a single unit-weight loop per node,
# matching PyG's add_remaining_self_loops for unit edge weights.
# --------------------------------------------------------------------------
def gcn_norm_dense_padded(edge_index, num_nodes, n_pad):
    src, dst = edge_index[0], edge_index[1]
    ew = jnp.where(src == dst, 0.0, 1.0).astype(jnp.float32)
    loop = jnp.arange(num_nodes, dtype=edge_index.dtype)
    src = jnp.concatenate([src, loop])
    dst = jnp.concatenate([dst, loop])
    ew = jnp.concatenate([ew, jnp.ones((num_nodes,), jnp.float32)])
    deg = jnp.zeros((num_nodes,), jnp.float32).at[dst].add(ew)
    dinv = jnp.where(deg > 0, jax.lax.rsqrt(deg), 0.0)
    norm = (dinv[src] * dinv[dst] * ew).astype(jnp.bfloat16)
    # out[i] = sum_j A_hat[i, j] * x[j]   (messages flow src -> dst)
    return jnp.zeros((n_pad, n_pad), jnp.bfloat16).at[dst, src].add(norm)


def graphnet1_forward(x, edge_index, w_gcn, b_gcn, *, row_tile=256):
    n, c_in = x.shape
    hidden = w_gcn.shape[1]

    c_pad = _round_up(c_in, 128)
    h_pad = _round_up(hidden, 128)
    vmem_budget = _vmem_limit_bytes()
    tm = _pick_row_tile(n, c_pad, h_pad, row_tile, vmem_budget)
    n_pad = _round_up(n, tm)
    grid_n = n_pad // tm

    # ---- BN0 hoisted to the wrapper: centered batch stats + bf16 cast ----
    x32 = x.astype(jnp.float32)
    mean0 = jnp.mean(x32, axis=0, keepdims=True)
    var0 = jnp.mean((x32 - mean0) ** 2, axis=0, keepdims=True)
    xn = (x32 - mean0) * jax.lax.rsqrt(var0 + EPS)
    xn_p = jnp.pad(xn, ((0, n_pad - n), (0, c_pad - c_in))).astype(jnp.bfloat16)

    a_hat = gcn_norm_dense_padded(edge_index, n, n_pad)
    w_p = jnp.pad(w_gcn, ((0, c_pad - c_in), (0, h_pad - hidden))).astype(jnp.bfloat16)
    b_p = jnp.pad(b_gcn.astype(jnp.float32), (0, h_pad - hidden)).reshape(1, h_pad)

    cp = pltpu.CompilerParams(dimension_semantics=("parallel",),
                              vmem_limit_bytes=vmem_budget)

    kernel1 = functools.partial(gcn_main_kernel, n_nodes=n)
    h_bf16, psum, psq = pl.pallas_call(
        kernel1,
        grid=(grid_n,),
        in_specs=[
            pl.BlockSpec((tm, n_pad), lambda i: (i, 0)),      # A_hat row tile (bf16)
            pl.BlockSpec((n_pad, c_pad), lambda i: (0, 0)),   # X_norm, resident (bf16)
            pl.BlockSpec((c_pad, h_pad), lambda i: (0, 0)),   # W, resident (bf16)
            pl.BlockSpec((1, h_pad), lambda i: (0, 0)),       # bias, resident (f32)
        ],
        out_specs=[
            pl.BlockSpec((tm, h_pad), lambda i: (i, 0)),      # h = relu(GCN) (bf16)
            pl.BlockSpec((1, 1, h_pad), lambda i: (i, 0, 0)), # BN1 partial sum
            pl.BlockSpec((1, 1, h_pad), lambda i: (i, 0, 0)), # BN1 partial sumsq
        ],
        out_shape=[
            jax.ShapeDtypeStruct((n_pad, h_pad), jnp.bfloat16),
            jax.ShapeDtypeStruct((grid_n, 1, h_pad), jnp.float32),
            jax.ShapeDtypeStruct((grid_n, 1, h_pad), jnp.float32),
        ],
        compiler_params=cp,
    )(a_hat, xn_p, w_p, b_p)

    # ---- tiny global reduce of per-tile partials (plain JAX) ----
    s1 = jnp.sum(psum, axis=0)                       # (1, h_pad)
    s2 = jnp.sum(psq, axis=0)                        # (1, h_pad)
    mean1 = s1 / n
    var1 = jnp.maximum(s2 / n - mean1 * mean1, 0.0)
    rstd1 = jax.lax.rsqrt(var1 + EPS)

    out = pl.pallas_call(
        bn_apply_kernel,
        grid=(grid_n,),
        in_specs=[
            pl.BlockSpec((tm, h_pad), lambda i: (i, 0)),
            pl.BlockSpec((1, h_pad), lambda i: (0, 0)),
            pl.BlockSpec((1, h_pad), lambda i: (0, 0)),
        ],
        out_specs=pl.BlockSpec((tm, h_pad), lambda i: (i, 0)),
        out_shape=jax.ShapeDtypeStruct((n_pad, h_pad), jnp.float32),
        compiler_params=cp,
    )(h_bf16, mean1, rstd1)

    return out[:n, :hidden]


if __name__ == "__main__":
    key = jax.random.PRNGKey(0)
    k_x, k_e, k_w, k_b = jax.random.split(key, 4)

    N, E = 40, 100          # nodes, edges (3 row tiles at row_tile=16, padded last tile)
    C_IN, HIDDEN = 8, 32    # c_in, hidden_size1

    x = jax.random.normal(k_x, (N, C_IN), dtype=jnp.float32)
    edge_index = jax.random.randint(k_e, (2, E), 0, N, dtype=jnp.int32)

    limit = (6.0 / (C_IN + HIDDEN)) ** 0.5
    w_gcn = jax.random.uniform(k_w, (C_IN, HIDDEN), jnp.float32, -limit, limit)
    b_gcn = 0.1 * jax.random.normal(k_b, (HIDDEN,), dtype=jnp.float32)

    out = graphnet1_forward(x, edge_index, w_gcn, b_gcn, row_tile=16)
    jax.block_until_ready(out)

    # Reference with the same bf16 quantization points as the kernel (the bf16
    # MXU operands are the intentional deviation from pure-f32 semantics).
    def ref(x, edge_index, w, b):
        n = x.shape[0]
        m0 = x.mean(0, keepdims=True)
        v0 = ((x - m0) ** 2).mean(0, keepdims=True)
        xn = ((x - m0) * jax.lax.rsqrt(v0 + EPS)).astype(jnp.bfloat16)
        a = gcn_norm_dense_padded(edge_index, n, n)
        agg = jnp.dot(a, xn, preferred_element_type=jnp.float32).astype(jnp.bfloat16)
        z = jnp.dot(agg, w.astype(jnp.bfloat16),
                    preferred_element_type=jnp.float32) + b
        h = jnp.maximum(z, 0.0)
        m1 = h.mean(0, keepdims=True)
        v1 = jnp.maximum((h * h).mean(0, keepdims=True) - m1 * m1, 0.0)
        return (h - m1) * jax.lax.rsqrt(v1 + EPS)

    ref_out = ref(x, edge_index, w_gcn, b_gcn)
    assert out.shape == (N, HIDDEN)
    assert jnp.allclose(out, ref_out, atol=5e-2, rtol=5e-2), "mismatch vs reference"
    print("KERNEL_OK")
</pallas_src>

<mosaic_0001>
module attributes {stable_mosaic.version = 11 : i64} {
  func.func @gcn_main_kernel(%arg0: i32, %arg1: memref<16x48xbf16, #tpu.memory_space<vmem>>, %arg2: memref<48x128xbf16, #tpu.memory_space<vmem>>, %arg3: memref<128x128xbf16, #tpu.memory_space<vmem>>, %arg4: memref<1x128xf32, #tpu.memory_space<vmem>>, %arg5: memref<16x128xbf16, #tpu.memory_space<vmem>>, %arg6: memref<1x1x128xf32, #tpu.memory_space<vmem>>, %arg7: memref<1x1x128xf32, #tpu.memory_space<vmem>>) attributes {dimension_semantics = [#tpu.dimension_semantics<parallel>], iteration_bounds = array<i64: 3>, scalar_prefetch = 0 : i64, scratch_operands = 0 : i64, tpu.core_type = #tpu.core_type<tc>, window_params = [{transform_indices = @transform_0, window_bounds = array<i64: 16, 48>}, {pipeline_mode = #tpu.pipeline_mode<synchronous>, transform_indices = @transform_1, window_bounds = array<i64: 48, 128>}, {pipeline_mode = #tpu.pipeline_mode<synchronous>, transform_indices = @transform_2, window_bounds = array<i64: 128, 128>}, {pipeline_mode = #tpu.pipeline_mode<synchronous>, transform_indices = @transform_3, window_bounds = array<i64: 1, 128>}, {transform_indices = @transform_4, window_bounds = array<i64: 16, 128>}, {transform_indices = @transform_5, window_bounds = array<i64: 1, 1, 128>}, {transform_indices = @transform_6, window_bounds = array<i64: 1, 1, 128>}]} {
    %c0 = arith.constant 0 : index
    %c0_0 = arith.constant 0 : index
    %0 = vector.load %arg1[%c0, %c0_0] : memref<16x48xbf16, #tpu.memory_space<vmem>>, vector<16x48xbf16>
    %c0_1 = arith.constant 0 : index
    %c0_2 = arith.constant 0 : index
    %1 = vector.load %arg2[%c0_1, %c0_2] : memref<48x128xbf16, #tpu.memory_space<vmem>>, vector<48x128xbf16>
    %cst = arith.constant dense<0.000000e+00> : vector<16x128xf32>
    %2 = tpu.matmul %0, %1, %cst {dimension_numbers = #tpu.dot_dimension_numbers<[1], [0], [0], [1], [0, 0, 1, 1], [], []>} : vector<16x48xbf16>, vector<48x128xbf16>, vector<16x128xf32> -> vector<16x128xf32>
    %3 = arith.truncf %2 : vector<16x128xf32> to vector<16x128xbf16>
    %c0_3 = arith.constant 0 : index
    %c0_4 = arith.constant 0 : index
    %4 = vector.load %arg3[%c0_3, %c0_4] : memref<128x128xbf16, #tpu.memory_space<vmem>>, vector<128x128xbf16>
    %cst_5 = arith.constant dense<0.000000e+00> : vector<16x128xf32>
    %5 = tpu.matmul %3, %4, %cst_5 {dimension_numbers = #tpu.dot_dimension_numbers<[1], [0], [0], [1], [0, 0, 1, 1], [], []>} : vector<16x128xbf16>, vector<128x128xbf16>, vector<16x128xf32> -> vector<16x128xf32>
    %c0_6 = arith.constant 0 : index
    %c0_7 = arith.constant 0 : index
    %6 = vector.load %arg4[%c0_6, %c0_7] : memref<1x128xf32, #tpu.memory_space<vmem>>, vector<1x128xf32>
    %7 = vector.broadcast %6 : vector<1x128xf32> to vector<16x128xf32>
    %8 = arith.addf %5, %7 : vector<16x128xf32>
    %cst_8 = arith.constant 0.000000e+00 : f32
    %9 = vector.broadcast %cst_8 : f32 to vector<16x128xf32>
    %10 = arith.maximumf %8, %9 : vector<16x128xf32>
    %11 = arith.truncf %10 : vector<16x128xf32> to vector<16x128xbf16>
    %c0_9 = arith.constant 0 : index
    %c0_10 = arith.constant 0 : index
    %12 = vector.load %arg5[%c0_9, %c0_10] : memref<16x128xbf16, #tpu.memory_space<vmem>>, vector<16x128xbf16>
    tpu.vector_store %arg5[%c0_9, %c0_10], %11 {strides = array<i32>} : memref<16x128xbf16, #tpu.memory_space<vmem>>, vector<16x128xbf16>,
    %c2_i32 = arith.constant 2 : i32
    %13 = arith.cmpi eq, %arg0, %c2_i32 : i32
    %14 = arith.extui %13 : i1 to i32
    %c0_i32 = arith.constant 0 : i32
    %15 = arith.cmpi ne, %14, %c0_i32 : i32
    scf.if %15 {
      %19 = tpu.iota {dimensions = array<i32: 0>} : vector<16x1xi32>
      %c16_i32 = arith.constant 16 : i32
      %20 = arith.muli %arg0, %c16_i32 : i32
      %21 = vector.broadcast %20 : i32 to vector<16x1xi32>
      %22 = arith.addi %19, %21 : vector<16x1xi32>
      %c40_i32 = arith.constant 40 : i32
      %23 = vector.broadcast %c40_i32 : i32 to vector<16x1xi32>
      %24 = arith.cmpi slt, %22, %23 : vector<16x1xi32>
      %cst_13 = arith.constant 0.000000e+00 : f32
      %25 = vector.shape_cast %24 : vector<16x1xi1> to vector<16x1xi1>
      %26 = vector.broadcast %25 : vector<16x1xi1> to vector<16x128xi1>
      %27 = vector.broadcast %cst_13 : f32 to vector<16x128xf32>
      %28 = arith.select %26, %10, %27 : vector<16x128xi1>, vector<16x128xf32>
      %cst_14 = arith.constant dense<0.000000e+00> : vector<128xf32>
      %29 = vector.multi_reduction <add>, %28, %cst_14 [0] : vector<16x128xf32> to vector<128xf32>
      %30 = vector.shape_cast %29 : vector<128xf32> to vector<1x128xf32>
      %31 = vector.shape_cast %30 : vector<1x128xf32> to vector<1x1x128xf32>
      %c0_15 = arith.constant 0 : index
      %c0_16 = arith.constant 0 : index
      %c0_17 = arith.constant 0 : index
      %32 = vector.load %arg6[%c0_15, %c0_16, %c0_17] : memref<1x1x128xf32, #tpu.memory_space<vmem>>, vector<1x1x128xf32>
      tpu.vector_store %arg6[%c0_15, %c0_16, %c0_17], %31 {strides = array<i32>} : memref<1x1x128xf32, #tpu.memory_space<vmem>>, vector<1x1x128xf32>,
      %33 = arith.mulf %28, %28 : vector<16x128xf32>
      %cst_18 = arith.constant dense<0.000000e+00> : vector<128xf32>
      %34 = vector.multi_reduction <add>, %33, %cst_18 [0] : vector<16x128xf32> to vector<128xf32>
      %35 = vector.shape_cast %34 : vector<128xf32> to vector<1x128xf32>
      %36 = vector.shape_cast %35 : vector<1x128xf32> to vector<1x1x128xf32>
      %c0_19 = arith.constant 0 : index
      %c0_20 = arith.constant 0 : index
      %c0_21 = arith.constant 0 : index
      %37 = vector.load %arg7[%c0_19, %c0_20, %c0_21] : memref<1x1x128xf32, #tpu.memory_space<vmem>>, vector<1x1x128xf32>
      tpu.vector_store %arg7[%c0_19, %c0_20, %c0_21], %36 {strides = array<i32>} : memref<1x1x128xf32, #tpu.memory_space<vmem>>, vector<1x1x128xf32>,
    } else {
    }
    %c2_i32_11 = arith.constant 2 : i32
    %16 = arith.cmpi ne, %arg0, %c2_i32_11 : i32
    %17 = arith.extui %16 : i1 to i32
    %c0_i32_12 = arith.constant 0 : i32
    %18 = arith.cmpi ne, %17, %c0_i32_12 : i32
    scf.if %18 {
      %cst_13 = arith.constant dense<0.000000e+00> : vector<128xf32>
      %19 = vector.multi_reduction <add>, %10, %cst_13 [0] : vector<16x128xf32> to vector<128xf32>
      %20 = vector.shape_cast %19 : vector<128xf32> to vector<1x128xf32>
      %21 = vector.shape_cast %20 : vector<1x128xf32> to vector<1x1x128xf32>
      %c0_14 = arith.constant 0 : index
      %c0_15 = arith.constant 0 : index
      %c0_16 = arith.constant 0 : index
      %22 = vector.load %arg6[%c0_14, %c0_15, %c0_16] : memref<1x1x128xf32, #tpu.memory_space<vmem>>, vector<1x1x128xf32>
      tpu.vector_store %arg6[%c0_14, %c0_15, %c0_16], %21 {strides = array<i32>} : memref<1x1x128xf32, #tpu.memory_space<vmem>>, vector<1x1x128xf32>,
      %23 = arith.mulf %10, %10 : vector<16x128xf32>
      %cst_17 = arith.constant dense<0.000000e+00> : vector<128xf32>
      %24 = vector.multi_reduction <add>, %23, %cst_17 [0] : vector<16x128xf32> to vector<128xf32>
      %25 = vector.shape_cast %24 : vector<128xf32> to vector<1x128xf32>
      %26 = vector.shape_cast %25 : vector<1x128xf32> to vector<1x1x128xf32>
      %c0_18 = arith.constant 0 : index
      %c0_19 = arith.constant 0 : index
      %c0_20 = arith.constant 0 : index
      %27 = vector.load %arg7[%c0_18, %c0_19, %c0_20] : memref<1x1x128xf32, #tpu.memory_space<vmem>>, vector<1x1x128xf32>
      tpu.vector_store %arg7[%c0_18, %c0_19, %c0_20], %26 {strides = array<i32>} : memref<1x1x128xf32, #tpu.memory_space<vmem>>, vector<1x1x128xf32>,
    } else {
    }
    return
  }
  func.func @transform_0(%arg0: i32) -> (i32, i32) {
    %c0_i32 = arith.constant 0 : i32
    %c0_i32_0 = arith.constant 0 : i32
    return %arg0, %c0_i32 : i32, i32
  }
  func.func @transform_1(%arg0: i32) -> (i32, i32) {
    %c0_i32 = arith.constant 0 : i32
    %c0_i32_0 = arith.constant 0 : i32
    %c0_i32_1 = arith.constant 0 : i32
    return %c0_i32, %c0_i32_0 : i32, i32
  }
  func.func @transform_2(%arg0: i32) -> (i32, i32) {
    %c0_i32 = arith.constant 0 : i32
    %c0_i32_0 = arith.constant 0 : i32
    %c0_i32_1 = arith.constant 0 : i32
    return %c0_i32, %c0_i32_0 : i32, i32
  }
  func.func @transform_3(%arg0: i32) -> (i32, i32) {
    %c0_i32 = arith.constant 0 : i32
    %c0_i32_0 = arith.constant 0 : i32
    %c0_i32_1 = arith.constant 0 : i32
    return %c0_i32, %c0_i32_0 : i32, i32
  }
  func.func @transform_4(%arg0: i32) -> (i32, i32) {
    %c0_i32 = arith.constant 0 : i32
    %c0_i32_0 = arith.constant 0 : i32
    return %arg0, %c0_i32 : i32, i32
  }
  func.func @transform_5(%arg0: i32) -> (i32, i32, i32) {
    %c0_i32 = arith.constant 0 : i32
    %c0_i32_0 = arith.constant 0 : i32
    %c0_i32_1 = arith.constant 0 : i32
    return %arg0, %c0_i32, %c0_i32_0 : i32, i32, i32
  }
  func.func @transform_6(%arg0: i32) -> (i32, i32, i32) {
    %c0_i32 = arith.constant 0 : i32
    %c0_i32_0 = arith.constant 0 : i32
    %c0_i32_1 = arith.constant 0 : i32
    return %arg0, %c0_i32, %c0_i32_0 : i32, i32, i32
  }
}

</mosaic_0001>

<bundles_post_ra>
// kernel: tpu_custom_call.1
= control target key start
LH: loop header
LB: loop body
LE: loop exit
PB: predicated region body
PF: predicated region fallthrough
CT: control target
= control target key end

     0   :  { %s1646_s0 = inlined_call_operand.hbm [shape: bf16[48,48], index: 0, kind: input, shape index: {}]   ;;  %s1647_s1 = inlined_call_operand.hbm [shape: bf16[48,128], index: 1, kind: input, shape index: {}]   ;;  %s1648_s2 = inlined_call_operand.hbm [shape: bf16[128,128], index: 2, kind: input, shape index: {}]   ;;  %s1649_s3 = inlined_call_operand.hbm [shape: f32[1,128], index: 3, kind: input, shape index: {}]   ;;  %s1650_s4 = inlined_call_operand.hbm [shape: bf16[48,128], index: 4, kind: output, shape index: {0}]   ;;  %s1651_s5 = inlined_call_operand.hbm [shape: f32[3,1,128], index: 5, kind: output, shape index: {1}]   ;;  %s1652_s6 = inlined_call_operand.hbm [shape: f32[3,1,128], index: 6, kind: output, shape index: {2}]  }
   0x1   :  { %1658 = sst [smem:[#allocation19_spill]] %s1646_s0 }
   0x2   :  { %12 = vsyncpa [#allocation3], 0 }
   0x3   :  { %14 = vsyncpa [#allocation3 + $0x1], 0 }
   0x4   :  { %15 = vsyncpa [#allocation6], 0 }
   0x5   :  { %16 = vsyncpa [#allocation9], 0 }
   0x6   :  { %17 = vsyncpa [#allocation4], 0 }
   0x7   :  { %19 = vsyncpa [#allocation4 + $0x1], 0 }
   0x8   :  { %20 = vsyncpa [#allocation12], 0 }
   0x9   :  { %22 = vsyncpa [#allocation12 + $0x1], 0  ;;  %s1290_s21 = smov 0   ;;  %s1292_s22 = smov 0  }
   0xa   :  { %s1294_s23 = smov 0   ;;  %s1296_s24 = smov 0  }
   0xb LB: > { %s1311_s25 = sadd.s32 4294967295, %s1240_s24   ;;  %s1654_s26 = sadd.s32 4294967294, %s1240_s24   ;;  %s1240_s24 = sphi %s1296_s24, %s1681_s24   ;;  %s1236_s23 = sphi %s1294_s23, %s1680_s23   ;;  %s1232_s22 = sphi %s1292_s22, %s1679_s22   ;;  %s1228_s21 = sphi %s1290_s21, %s1678_s21  }
   0xc   : > { %p48_p0 = scmp.ne.s32.totalorder %s1232_s22, %s1228_s21  ;;  %p1653_p1 = scmp.eq.s32.totalorder %s1311_s25, 0 }
   0xd   : > { %p141_p3 = scmp.eq.s32.totalorder %s1654_s26, 2  ;;  %p795_p5 = scmp.ge.s32.totalorder %s1240_s24, 1 }
   0xe   : > { %p1322_p4 = por %p1653_p1, %p48_p0  ;;  %p200_p7 = scmp.lt.s32.totalorder %s1240_s24, 4 }
   0xf   : > { %p1327_p6 = por %p141_p3, %p48_p0  ;;  %s1242_s30 = smov [#allocation5]  }
  0x10   : > { %s1659_s27 = scalar_select %p1322_p4, 1, 0 }
  0x11   : > { %s1660_s28 = scalar_select %p1327_p6, 1, 0 }
  0x12   : > { %p1332_p8 = pnand %p795_p5, %p200_p7  ;;  %s212_s7 = sshll.u32 %s1242_s30, 4  ;;  %s1336_s7 = int_to_ptr.vmem [resolvable:$true] %s212_s7 }
  0x13   : > { %s1243_s9 = smov [#allocation7]   ;;  %s1244_s11 = smov [#allocation8]  }
  0x14   : > { %s1661_s29 = scalar_select %p1332_p8, 1, 0 }
  0x15   : > { %p907_p9 = pneg %p1332_p8  ;;  %s225_s10 = sshll.u32 %s1243_s9, 4  ;;  %s1346_s10 = int_to_ptr.vmem [resolvable:$true] %s225_s10 }
  0x16   : > { %s1348_s12 = sshll.u32 %s1244_s11, 4  ;;  %s992_s15 = scalar_lea.hbm %s1647_s1, 384  ;;  %s240_s12 = int_to_ptr.vmem [resolvable:$true] %s1348_s12 }
  0x17   : > { %p1342_p10 = pnand %p907_p9, %p1653_p1  ;;  %p993_p11 = scmp.ne.s32.totalorder %s1647_s1, %s992_s15 }
  0x18   : > { %p999_p3 = scmp.lt.u32.totalorder %s992_s15, %s1647_s1 }
  0x19   : > { %p1358_p12 = pneg %p1342_p10 }
  0x1b   : > { %p995_p13 = pnand %p1358_p12, %p993_p11 }
  0x1d   : > { %p996_p0 = pneg %p995_p13 }
  0x1f   : > { %p1001_p5 = pnand %p999_p3, %p996_p0 }
  0x21   : > { %1004 = shalt.err (!%p1001_p5)
}
  0x22   : > { %s1005_s30 = scalar_lea.vmem %s1336_s7, 384  ;;  %p1013_p2 = scmp.lt.s32.totalorder %s1336_s7, %s1336_s7 }
  0x23   : > { %p1006_p7 = scmp.ne.s32.totalorder %s1336_s7, %s1005_s30  ;;  %p1014_p6 = scmp.lt.s32.totalorder %s1005_s30, %s1005_s30 }
  0x25   : > { %p1008_p9 = pnand %p1006_p7, %p1358_p12  ;;  %p1015_p11 = por %p1014_p6, %p1013_p2 }
  0x27   : > { %p1009_p1 = pneg %p1008_p9 }
  0x29   : > { %p1016_p13 = pnand %p1015_p11, %p1009_p1 }
  0x2b   : > { %1019 = shalt.err (!%p1016_p13)
}
  0x2c   : > { %s1245_s9 = smov 64   ;;  %s1246_s11 = smov 4  }
  0x2d   : > { %910 = dma.hbm_to_vmem [thread:$0]  (!%p1342_p10), %s1647_s1, 384, %s1336_s7, [#allocation6], %s1245_s9, %s1245_s9, %s1246_s11  }
  0x2e   : > { %s1020_s17 = scalar_lea.hbm %s1648_s2, 1024 }
  0x2f   : > { %p1021_p1 = scmp.ne.s32.totalorder %s1648_s2, %s1020_s17  ;;  %p1027_p0 = scmp.lt.u32.totalorder %s1020_s17, %s1648_s2 }
  0x31   : > { %p1023_p2 = pnand %p1021_p1, %p1358_p12 }
  0x33   : > { %p1024_p6 = pneg %p1023_p2 }
  0x35   : > { %p1029_p3 = pnand %p1027_p0, %p1024_p6 }
  0x37   : > { %1032 = shalt.err (!%p1029_p3)
}
  0x38   : > { %s1033_s7 = scalar_lea.vmem %s1346_s10, 1024  ;;  %p1041_p11 = scmp.lt.s32.totalorder %s1346_s10, %s1346_s10 }
  0x39   : > { %p1034_p5 = scmp.ne.s32.totalorder %s1346_s10, %s1033_s7  ;;  %p1042_p13 = scmp.lt.s32.totalorder %s1033_s7, %s1033_s7 }
  0x3b   : > { %p1036_p7 = pnand %p1034_p5, %p1358_p12  ;;  %p1043_p1 = por %p1042_p13, %p1041_p11 }
  0x3d   : > { %p1037_p9 = pneg %p1036_p7 }
  0x3f   : > { %p1044_p2 = pnand %p1043_p1, %p1037_p9 }
  0x41   : > { %1047 = shalt.err (!%p1044_p2)
}
  0x42   : > { %913 = dma.hbm_to_vmem [thread:$0]  (!%p1342_p10), %s1648_s2, 1024, %s1346_s10, [#allocation6], %s1245_s9, %s1245_s9, %s1246_s11  }
  0x43   : > { %s1048_s16 = scalar_lea.hbm %s1649_s3, 16 }
  0x44   : > { %p1049_p6 = scmp.ne.s32.totalorder %s1649_s3, %s1048_s16  ;;  %p1055_p5 = scmp.lt.u32.totalorder %s1048_s16, %s1649_s3 }
  0x46   : > { %p1051_p0 = pnand %p1049_p6, %p1358_p12 }
  0x48   : > { %p1052_p3 = pneg %p1051_p0 }
  0x4a   : > { %p1057_p7 = pnand %p1055_p5, %p1052_p3 }
  0x4c   : > { %1060 = shalt.err (!%p1057_p7)
}
  0x4d   : > { %s1061_s7 = scalar_lea.vmem %s240_s12, 16  ;;  %s1068_s10 = scalar_lea.vmem %s240_s12, 32 }
  0x4e   : > { %p1062_p9 = scmp.ne.s32.totalorder %s240_s12, %s1061_s7  ;;  %p1069_p1 = scmp.lt.s32.totalorder %s240_s12, %s240_s12 }
  0x4f   : > { %p1070_p2 = scmp.lt.s32.totalorder %s1068_s10, %s1061_s7 }
  0x50   : > { %p1064_p11 = pnand %p1062_p9, %p1358_p12 }
  0x51   : > { %p1071_p4 = por %p1070_p2, %p1069_p1 }
  0x52   : > { %p1065_p13 = pneg %p1064_p11 }
  0x54   : > { %p1072_p8 = pnand %p1071_p4, %p1065_p13 }
  0x56   : > { %1075 = shalt.err (!%p1072_p8)
}
  0x57   : > { %916 = dma.hbm_to_vmem [thread:$0]  (!%p1342_p10), %s1649_s3, 16, %s240_s12, [#allocation9]  }
  0x58   : > { %s1428_s18 = sadd.s32 1, %s1240_s24   ;;  %s35_s8 = sadd.s32 1, %s1236_s23 }
  0x59   : > { %s32_s14 = ssub.s32 %s1240_s24, %s1428_s18  ;;  %p42_p8 = scmp.ne.s32.totalorder %s1236_s23, %s1232_s22 }
  0x5a   : > { %p33_p4 = scmp.eq.s32.totalorder %s32_s14, 0  ;;  %p43_p12 = scmp.eq.s32.totalorder %s1240_s24, 0 }
  0x5b   : > { %p934_p6 = scmp.lt.s32.totalorder %s1240_s24, 3  ;;  %p1664_p3 = scmp.eq.s32.totalorder %s1311_s25, 2 }
  0x5c   : > { %s1438_s15 = scalar_select %p33_p4, %s1236_s23, %s35_s8  }
  0x5d   : > { %p44_p0 = por %p43_p12, %p42_p8  ;;  %p1442_p5 = por %p1664_p3, %p42_p8 }
  0x5e   : > { %s250_s17 = sand.u32 1, %s1236_s23   ;;  %s835_s19 = sshll.u32 %s1240_s24, 7 }
  0x5f   : > { %s800_s12 = sshll.u32 %s250_s17, 3  ;;  %s1666_s0 = sld [smem:[#allocation19_spill]] }
  0x60   : > { %s254_s10 = scalar_lea.vmem [#allocation2], %s800_s12  ;;  %p1453_p10 = pnand %p934_p6, %p44_p0 }
  0x61   : > { %s261_s26 = sshll.u32 %s254_s10, 4  ;;  %s1459_s14 = scalar_lea.sflag [#allocation3], %s250_s17  ;;  %s1457_s26 = int_to_ptr.vmem [resolvable:$true] %s261_s26 }
  0x62   : > { %p1078_p9 = pneg %p1453_p10 }
  0x65   : > { %s1451_s7 = scalar_lea.hbm %s1666_s0, %s835_s19  ;;  %s1081_s20 = scalar_lea.hbm %s1666_s0, 384 }
  0x66   : > { %s1076_s8 = scalar_lea.hbm %s1451_s7, 128  ;;  %p1082_p1 = scmp.lt.u32.totalorder %s1451_s7, %s1666_s0 }
  0x67   : > { %p1077_p7 = scmp.ne.s32.totalorder %s1451_s7, %s1076_s8  ;;  %p1083_p2 = scmp.lt.u32.totalorder %s1081_s20, %s1076_s8 }
  0x68   : > { %p1085_p8 = scmp.lt.u32.totalorder %s1076_s8, %s1451_s7 }
  0x69   : > { %p1079_p11 = pnand %p1078_p9, %p1077_p7  ;;  %p1084_p4 = por %p1083_p2, %p1082_p1 }
  0x6b   : > { %p1080_p13 = pneg %p1079_p11  ;;  %p1086_p12 = por %p1085_p8, %p1084_p4 }
  0x6d   : > { %p1087_p6 = pnand %p1086_p12, %p1080_p13 }
  0x6f   : > { %1090 = shalt.err (!%p1087_p6)
}
  0x70   : > { %s1091_s17 = scalar_lea.vmem %s1457_s26, 128  ;;  %s1247_s19 = smov [#allocation2]  }
  0x71   : > { %p1092_p0 = scmp.ne.s32.totalorder %s1457_s26, %s1091_s17  ;;  %s1096_s12 = sshll.u32 %s1247_s19, 4  ;;  %s1097_s12 = int_to_ptr.vmem [resolvable:$false] %s1096_s12 }
  0x72   : > { %s1098_s30 = scalar_lea.vmem %s1097_s12, 256  ;;  %p1099_p11 = scmp.lt.s32.totalorder %s1457_s26, %s1097_s12 }
  0x73   : > { %p1094_p3 = pnand %p1092_p0, %p1078_p9  ;;  %p1100_p1 = scmp.lt.s32.totalorder %s1098_s30, %s1091_s17 }
  0x75   : > { %p1095_p7 = pneg %p1094_p3  ;;  %p1101_p2 = por %p1100_p1, %p1099_p11 }
  0x77   : > { %p1102_p4 = pnand %p1101_p2, %p1095_p7 }
  0x79   : > { %1105 = shalt.err (!%p1102_p4)
}
  0x7a   : > { %920 = dma.hbm_to_vmem [thread:$0]  (!%p1453_p10), %s1451_s7, 128, %s1457_s26, %s1459_s14, %s1245_s9, %s1245_s9, %s1246_s11  }
  0x7b   : > { %p1668_p9 = scmp.ne.s32.totalorder %s1661_s29, 0 }
  0x7c   : > { %s1493_s8 = sand.u32 (!%p1668_p9), 1, %s1232_s22   ;;  %p1669_p13 = scmp.ne.s32.totalorder (!%p1668_p9), %s1659_s27, 0 }
  0x7d   : > { %273 = sbr.rel (%p1668_p9) target bundleno = 698 (0x2ba), region = 36  ;;  %s804_s20 = sshll.u32 (!%p1668_p9), %s1493_s8, 3 }
  0x7e   : > { %s276_s10 = scalar_lea.sflag (!%p1668_p9), [#allocation3], %s1493_s8  ;;  %s279_s13 = scalar_lea.vmem (!%p1668_p9), [#allocation2], %s804_s20 }
  0x84   : > { %1207 = dma.done.wait (%p1669_p13), %s276_s10, 128  }
  0x85   : > { %1209 = vsyncadd (%p1669_p13), %s276_s10, 4294967168  ;;  %p1670_p10 = scmp.eq.s32.totalorder %s1311_s25, 0 }
  0x87   : > { %1211 = dma.done.wait (%p1670_p10), [#allocation6], 1408   ;;  %p1671_p8 = pmov %p1670_p10 }
  0x89   : > { %1213 = vsyncadd (%p1671_p8), [#allocation6], 4294965888  ;;  %p1672_p12 = pmov %p1671_p8 }
  0x8a   : > { %p1673_p6 = pmov %p1671_p8 }
  0x8b   : > { %1215 = dma.done.wait (%p1672_p12), [#allocation9], 16  }
  0x8c   : > { %1217 = vsyncadd (%p1673_p6), [#allocation9], 4294967280  ;;  %v1248_v0 = vmov 0.0   ;;  %vm1249_vm0 = vmmov 0   ;;  %v980_v1 = vld [vmem:[#allocation5] sm:$0xff]   ;;  %v981_v2 = vld [vmem:[#allocation5 + $0x8] sm:$0xff]  }
  0x8d   : > { %857 = vmatprep.subr.bf16.mxu0 %v1248_v0  ;;  %863 = vmatprep.mubr.msk.bf16.mxu0 %vm1249_vm0, %v1248_v0  ;;  %v984_v3 = vld [vmem:[#allocation7] sm:$0xff]   ;;  %v982_v4 = vld [vmem:[#allocation5 + $0x10] sm:$0xff]   ;;  %v985_v5 = vld [vmem:[#allocation7 + $0x8] sm:$0xff]   ;;  %vm362_vm1 = vcmask 392192   ;;  %s1513_s27 = scalar_lea.vmem [#allocation10], %s804_s20  ;;  %s1517_s29 = scalar_lea.vmem [#allocation11], %s1493_s8 }
  0x8e   : > { %867 = vmatprep.subr.bf16.mxu1 %v1248_v0  ;;  %883 = vmatprep.mubr.msk.bf16.mxu1 %vm1249_vm0, %v1248_v0  ;;  %v983_v6 = vld [vmem:[%s279_s13] sm:$0xff]   ;;  %v986_v7 = vld [vmem:[#allocation7 + $0x10] sm:$0xff]   ;;  %v989_v10 = vld [vmem:[#allocation7 + $0x28] sm:$0xff]   ;;  %s1520_s9 = scalar_lea.vmem [#allocation13], %s1493_s8  ;;  %p825_p0 = scmp.ne.s32.totalorder %s1311_s25, 2 }
  0x8f   : > { %858 = vmatpush3.bf16.msra.mxu0 %v980_v1  ;;  %868 = vmatpush3.bf16.msra.mxu1 %v984_v3  ;;  %v987_v8 = vld [vmem:[#allocation7 + $0x18] sm:$0xff]   ;;  %v988_v9 = vld [vmem:[#allocation7 + $0x20] sm:$0xff]   ;;  %v990_v11 = vld [vmem:[#allocation7 + $0x30] sm:$0xff]   ;;  %v536_v28 = vlaneseq (!%p825_p0)  ;;  %s826_s11 = sshll.u32 (!%p825_p0), %s1311_s25, 4 }
  0x90   : > { %859 = vmatprep.subr.bf16.mxu0 %v1248_v0  ;;  %869 = vmatprep.subr.bf16.mxu1 %v1248_v0  ;;  %v991_v12 = vld [vmem:[#allocation7 + $0x38] sm:$0xff]   ;;  %v814_v18 = vld [vmem:[#allocation8] ss:$0 sm:$0xff]  ;;  %v540_v29 = vstv (!%p825_p0), %s826_s11 }
  0x91   : > { %v537_v30 = vshrl.u32 (!%p825_p0), %v536_v28, 7 }
  0x93   : > { %860 = vmatpush3.bf16.msra.mxu0 %v981_v2  ;;  %870 = vmatpush3.bf16.msra.mxu1 %v985_v5  ;;  %v538_v31 = vadd.s32 (!%p825_p0), 8, %v537_v30  ;;  %v541_v32 = vadd.s32 (!%p825_p0), %v540_v29, %v537_v30 }
  0x94   : > { %861 = vmatprep.subr.bf16.mxu0 %v1248_v0  ;;  %871 = vmatprep.subr.bf16.mxu1 %v1248_v0 }
  0x95   : > { %v542_v33 = vadd.s32 (!%p825_p0), %v540_v29, %v538_v31  ;;  %vm543_vm2 = vcmp.lt.s32.totalorder (!%p825_p0), %v541_v32, 40 }
  0x97   : > { %862 = vmatpush3.bf16.msra.mxu0 %v982_v4  ;;  %872 = vmatpush3.bf16.msra.mxu1 %v986_v7  ;;  %vm544_vm3 = vcmp.lt.s32.totalorder (!%p825_p0), %v542_v33, 40 }
  0x98   : > { %873 = vmatprep.subr.bf16.mxu1 %v1248_v0 }
  0x9a   : > { %864 = vmatmul.mubr.msk.bf16.vlgmr.msra.gmra.mrb[0].mxu0 %vm362_vm1, %v983_v6 }
  0x9b   : > { %874 = vmatpush3.bf16.msra.mxu1 %v987_v8 }
  0x9c   : > { %875 = vmatprep.subr.bf16.mxu1 %v1248_v0 }
  0x9f   : > { %876 = vmatpush3.bf16.msra.mxu1 %v988_v9 }
  0xa0   : > { %877 = vmatprep.subr.bf16.mxu1 %v1248_v0 }
  0xa3   : > { %878 = vmatpush3.bf16.msra.mxu1 %v989_v10 }
  0xa4   : > { %879 = vmatprep.subr.bf16.mxu1 %v1248_v0 }
  0xa7   : > { %880 = vmatpush3.bf16.msra.mxu1 %v990_v11 }
  0xa8   : > { %881 = vmatprep.subr.bf16.mxu1 %v1248_v0 }
  0xab   : > { %882 = vmatpush3.bf16.msra.mxu1 %v991_v12 }
 0x16d   : > { %v400_v13 = vpop.f32.mrb[0].mxu0 }
 0x16e   : > { %v865_v14 = vpop.f32.mrb[1].mxu0 }
 0x16f   : > { %v403_v15 = vpop.f32.mrb[2].mxu0 }
 0x170   : > { %v407_v16 = vpack.c.bf16 %v403_v15, %v400_v13  ;;  %v866_v17 = vpop.f32.mrb[3].mxu0 }
 0x172   : > { %884 = vmatmul.mubr.bf16.vlgmr.msra.gmra.mrb[0].mxu1 %v407_v16 }
 0x245   : > { %v513_v19 = vpop.f32.mrb[0].mxu1 }
 0x246   : > { %v514_v20 = vadd.f32 %v814_v18, %v513_v19  ;;  %v885_v21 = vpop.f32.mrb[1].mxu1 }
 0x247   : > { %v516_v22 = vpop.f32.mrb[2].mxu1 }
 0x248   : > { %v517_v23 = vadd.f32 %v814_v18, %v516_v22  ;;  %v886_v24 = vpop.f32.mrb[3].mxu1  ;;  %v520_v25 = vmax.f32 %v514_v20, 0.0  ;;  %535 = sbr.rel (%p825_p0) target bundleno = 606 (0x25e), region = 56 }
 0x24a   : > { %v521_v26 = vmax.f32 %v517_v23, 0.0  ;;  %v549_v34 = vsel (!%p825_p0), %vm543_vm2, %v520_v25, 0.0 }
 0x24b   : > { %v559_v35 = vmul.f32 (!%p825_p0), %v549_v34, %v549_v34 }
 0x24c   : > { %v842_v27 = vpack.c.bf16 %v521_v26, %v520_v25  ;;  %v550_v36 = vsel (!%p825_p0), %vm544_vm3, %v521_v26, 0.0 }
 0x24d   : > { %v551_v37 = vadd.f32 (!%p825_p0), %v550_v36, %v549_v34  ;;  %v560_v38 = vmul.f32 (!%p825_p0), %v550_v36, %v550_v36 }
 0x24e   : > { %843 = vst [vmem:[%s1513_s27] sm:$0xff] %v842_v27  }
 0x24f   : > { %v552_v39 = vrot.slane %v551_v37, 4  ;;  %v561_v40 = vadd.f32 %v560_v38, %v559_v35 }
 0x251   : > { %v553_v41 = vadd.f32 %v552_v39, %v551_v37  ;;  %v562_v42 = vrot.slane %v561_v40, 4 }
 0x253   : > { %v554_v43 = vrot.slane %v553_v41, 2  ;;  %v563_v44 = vadd.f32 %v562_v42, %v561_v40 }
 0x255   : > { %v555_v45 = vadd.f32 %v554_v43, %v553_v41  ;;  %v564_v46 = vrot.slane %v563_v44, 2 }
 0x257   : > { %v556_v47 = vrot.slane %v555_v45, 1  ;;  %v565_v48 = vadd.f32 %v564_v46, %v563_v44 }
 0x259   : > { %v557_v49 = vadd.f32 %v556_v47, %v555_v45  ;;  %v566_v50 = vrot.slane %v565_v48, 1 }
 0x25b   : > { %558 = vst [vmem:[%s1517_s29] sm:$0x1] %v557_v49  ;;  %v567_v51 = vadd.f32 %v566_v50, %v565_v48 }
 0x25d   : > { %568 = vst [vmem:[%s1520_s9] sm:$0x1] %v567_v51 }
 0x25e PF: > { %p1674_p3 = scmp.eq.s32.totalorder %s1311_s25, 2 }
 0x25f   : > { %v573_v52 = vadd.f32 (!%p1674_p3), %v521_v26, %v520_v25  ;;  %v581_v53 = vmul.f32 (!%p1674_p3), %v520_v25, %v520_v25  ;;  %v582_v54 = vmul.f32 (!%p1674_p3), %v521_v26, %v521_v26 }
 0x260   : > { %572 = sbr.rel (%p1674_p3) target bundleno = 624 (0x270), region = 60 }
 0x261   : > { %v574_v55 = vrot.slane (!%p1674_p3), %v573_v52, 4  ;;  %v583_v56 = vadd.f32 (!%p1674_p3), %v582_v54, %v581_v53 }
 0x263   : > { %v575_v57 = vadd.f32 (!%p1674_p3), %v574_v55, %v573_v52  ;;  %v584_v58 = vrot.slane (!%p1674_p3), %v583_v56, 4 }
 0x265   : > { %v576_v59 = vrot.slane (!%p1674_p3), %v575_v57, 2  ;;  %v585_v60 = vadd.f32 (!%p1674_p3), %v584_v58, %v583_v56 }
 0x267   : > { %v577_v61 = vadd.f32 %v576_v59, %v575_v57  ;;  %v586_v62 = vrot.slane %v585_v60, 2 }
 0x269   : > { %v578_v63 = vrot.slane %v577_v61, 1  ;;  %v587_v0 = vadd.f32 %v586_v62, %v585_v60 }
 0x26b   : > { %v579_v1 = vadd.f32 %v578_v63, %v577_v61  ;;  %v588_v2 = vrot.slane %v587_v0, 1 }
 0x26d   : > { %580 = vst [vmem:[%s1517_s29] sm:$0x1] %v579_v1  ;;  %v589_v3 = vadd.f32 %v588_v2, %v587_v0 }
 0x26f   : > { %590 = vst [vmem:[%s1520_s9] sm:$0x1] %v589_v3 }
 0x270 PF: > { %s596_s7 = sand.u32 1, %s1311_s25   ;;  %s1657_s26 = sshll.u32 %s1311_s25, 4 }
 0x271   : > { %s1537_s19 = scalar_lea.hbm %s1651_s5, %s1657_s26  ;;  %s629_s12 = sshll.u32 %s1517_s29, 4  ;;  %s1540_s12 = int_to_ptr.vmem [resolvable:$true] %s629_s12 }
 0x272   : > { %s838_s30 = sshll.u32 %s1311_s25, 7  ;;  %s1543_s20 = scalar_lea.sflag [#allocation12], %s596_s7 }
 0x273   : > { %s1106_s10 = scalar_lea.vmem %s1540_s12, 16  ;;  %s1250_s13 = smov [#allocation11]  }
 0x274   : > { %p1107_p7 = scmp.ne.s32.totalorder %s1540_s12, %s1106_s10  ;;  %s1110_s11 = sshll.u32 %s1250_s13, 4  ;;  %s1111_s11 = int_to_ptr.vmem [resolvable:$false] %s1110_s11 }
 0x275   : > { %s1112_s14 = scalar_lea.vmem %s1111_s11, 32  ;;  %p1113_p2 = scmp.lt.s32.totalorder %s1540_s12, %s1111_s11 }
 0x276   : > { %p1108_p11 = pnand %p1107_p7, %p1442_p5  ;;  %p1114_p4 = scmp.lt.s32.totalorder %s1112_s14, %s1106_s10 }
 0x278   : > { %p1109_p1 = pneg %p1108_p11  ;;  %p1115_p9 = por %p1114_p4, %p1113_p2 }
 0x27a   : > { %p1116_p13 = pnand %p1115_p9, %p1109_p1 }
 0x27c   : > { %1119 = shalt.err (!%p1116_p13)
}
 0x27d   : > { %s1120_s29 = scalar_lea.hbm %s1537_s19, 16  ;;  %s1124_s13 = scalar_lea.hbm %s1651_s5, 48 }
 0x27e   : > { %p1121_p10 = scmp.ne.s32.totalorder %s1537_s19, %s1120_s29  ;;  %p1125_p6 = scmp.lt.u32.totalorder %s1537_s19, %s1651_s5 }
 0x27f   : > { %p1126_p0 = scmp.lt.u32.totalorder %s1124_s13, %s1120_s29  ;;  %p1128_p7 = scmp.lt.u32.totalorder %s1120_s29, %s1537_s19 }
 0x280   : > { %p1122_p8 = pnand %p1121_p10, %p1442_p5 }
 0x281   : > { %p1127_p3 = por %p1126_p0, %p1125_p6 }
 0x282   : > { %p1123_p12 = pneg %p1122_p8 }
 0x283   : > { %p1129_p11 = por %p1128_p7, %p1127_p3 }
 0x285   : > { %p1130_p1 = pnand %p1129_p11, %p1123_p12 }
 0x287   : > { %1133 = shalt.err (!%p1130_p1)
}
 0x288   : > { %902 = dma.vmem_to_hbm [thread:$0]  (%p1442_p5), %s1540_s12, 16, %s1537_s19, %s1543_s20  }
 0x289   : > { %s1572_s14 = scalar_lea.hbm %s1650_s4, %s838_s30  ;;  %s613_s29 = sshll.u32 %s1513_s27, 4  ;;  %s1575_s29 = int_to_ptr.vmem [resolvable:$true] %s613_s29 }
 0x28a   : > { %s1675_s7 = sshll.u32 %s1311_s25, 4  ;;  %s592_s0 = scalar_lea.sflag [#allocation4], %s1493_s8 }
 0x28b   : > { %s1582_s11 = scalar_lea.hbm %s1652_s6, %s1675_s7  ;;  %s1134_s19 = scalar_lea.vmem %s1575_s29, 128 }
 0x28c   : > { %p1135_p2 = scmp.ne.s32.totalorder %s1575_s29, %s1134_s19  ;;  %s1251_s12 = smov [#allocation10]  }
 0x28d   : > { %s1138_s30 = sshll.u32 %s1251_s12, 4  ;;  %s1139_s30 = int_to_ptr.vmem [resolvable:$false] %s1138_s30 }
 0x28e   : > { %p1136_p4 = pnand %p1135_p2, %p1442_p5  ;;  %s1140_s27 = scalar_lea.vmem %s1139_s30, 256 }
 0x28f   : > { %p1141_p13 = scmp.lt.s32.totalorder %s1575_s29, %s1139_s30  ;;  %p1142_p10 = scmp.lt.s32.totalorder %s1140_s27, %s1134_s19 }
 0x290   : > { %p1137_p9 = pneg %p1136_p4 }
 0x291   : > { %p1143_p8 = por %p1142_p10, %p1141_p13 }
 0x293   : > { %p1144_p12 = pnand %p1143_p8, %p1137_p9 }
 0x295   : > { %1147 = shalt.err (!%p1144_p12)
}
 0x296   : > { %s1148_s25 = scalar_lea.hbm %s1572_s14, 128  ;;  %s1152_s7 = scalar_lea.hbm %s1650_s4, 384 }
 0x297   : > { %p1149_p6 = scmp.ne.s32.totalorder %s1572_s14, %s1148_s25  ;;  %p1153_p7 = scmp.lt.u32.totalorder %s1572_s14, %s1650_s4 }
 0x298   : > { %p1154_p11 = scmp.lt.u32.totalorder %s1152_s7, %s1148_s25  ;;  %p1156_p2 = scmp.lt.u32.totalorder %s1148_s25, %s1572_s14 }
 0x299   : > { %p1150_p0 = pnand %p1149_p6, %p1442_p5 }
 0x29a   : > { %p1155_p1 = por %p1154_p11, %p1153_p7 }
 0x29b   : > { %p1151_p3 = pneg %p1150_p0 }
 0x29c   : > { %p1157_p4 = por %p1156_p2, %p1155_p1 }
 0x29e   : > { %p1158_p9 = pnand %p1157_p4, %p1151_p3 }
 0x2a0   : > { %1161 = shalt.err (!%p1158_p9)
}
 0x2a1   : > { %s1252_s19 = smov 64   ;;  %s1253_s12 = smov 4  }
 0x2a2   : > { %901 = dma.vmem_to_hbm [thread:$0]  (%p1442_p5), %s1575_s29, 128, %s1572_s14, %s592_s0, %s1252_s19, %s1252_s19, %s1253_s12  }
 0x2a3   : > { %s642_s30 = sshll.u32 %s1520_s9, 4  ;;  %s1254_s25 = smov [#allocation13]   ;;  %s643_s30 = int_to_ptr.vmem [resolvable:$true] %s642_s30 }
 0x2a4   : > { %s1162_s27 = scalar_lea.vmem %s643_s30, 16  ;;  %s1166_s26 = sshll.u32 %s1254_s25, 4  ;;  %s1167_s26 = int_to_ptr.vmem [resolvable:$false] %s1166_s26 }
 0x2a5   : > { %p1163_p13 = scmp.ne.s32.totalorder %s643_s30, %s1162_s27  ;;  %s1168_s10 = scalar_lea.vmem %s1167_s26, 32 }
 0x2a6   : > { %p1169_p12 = scmp.lt.s32.totalorder %s643_s30, %s1167_s26  ;;  %p1170_p6 = scmp.lt.s32.totalorder %s1168_s10, %s1162_s27 }
 0x2a7   : > { %p1164_p10 = pnand %p1163_p13, %p1442_p5 }
 0x2a8   : > { %p1171_p0 = por %p1170_p6, %p1169_p12 }
 0x2a9   : > { %p1165_p8 = pneg %p1164_p10 }
 0x2ab   : > { %p1172_p3 = pnand %p1171_p0, %p1165_p8 }
 0x2ad   : > { %1175 = shalt.err (!%p1172_p3)
}
 0x2ae   : > { %s1176_s0 = scalar_lea.hbm %s1582_s11, 16  ;;  %s1180_s14 = scalar_lea.hbm %s1652_s6, 48 }
 0x2af   : > { %p1177_p7 = scmp.ne.s32.totalorder %s1582_s11, %s1176_s0  ;;  %p1181_p2 = scmp.lt.u32.totalorder %s1582_s11, %s1652_s6 }
 0x2b0   : > { %p1182_p4 = scmp.lt.u32.totalorder %s1180_s14, %s1176_s0  ;;  %p1184_p13 = scmp.lt.u32.totalorder %s1176_s0, %s1582_s11 }
 0x2b1   : > { %p1178_p11 = pnand %p1177_p7, %p1442_p5 }
 0x2b2   : > { %p1183_p9 = por %p1182_p4, %p1181_p2 }
 0x2b3   : > { %p1179_p1 = pneg %p1178_p11 }
 0x2b4   : > { %p1185_p10 = por %p1184_p13, %p1183_p9 }
 0x2b6   : > { %p1186_p8 = pnand %p1185_p10, %p1179_p1 }
 0x2b8   : > { %1189 = shalt.err (!%p1186_p8)
}
 0x2b9   : > { %903 = dma.vmem_to_hbm [thread:$0]  (%p1442_p5), %s643_s30, 16, %s1582_s11, %s1543_s20  }
 0x2ba PF: > { %p938_p12 = scmp.ge.s32.totalorder %s1240_s24, 2  ;;  %s654_s17 = sand.u32 1, %s1228_s21  }
 0x2bb   : > { %p1676_p6 = scmp.ne.s32.totalorder %s1660_s28, 0  ;;  %s655_s13 = scalar_lea.sflag [#allocation4], %s654_s17 }
 0x2bd   : > { %p922_p0 = pnand %p938_p12, %p1676_p6 }
 0x2bf   : > { %1219 = dma.done.wait (!%p922_p0), %s655_s13, 128  }
 0x2c0   : > { %1221 = vsyncadd (!%p922_p0), %s655_s13, 4294967168  ;;  %s1677_s19 = sadd.s32 4294967294, %s1240_s24  }
 0x2c1   : > { %s663_s12 = sand.u32 1, %s1677_s19  }
 0x2c2   : > { %s664_s27 = scalar_lea.sflag [#allocation12], %s663_s12 }
 0x2c3   : > { %1223 = dma.done.wait (!%p922_p0), %s664_s27, 32  }
 0x2c4   : > { %1225 = vsyncadd (!%p922_p0), %s664_s27, 4294967264  ;;  %p25_p5 = scmp.ge.s32.totalorder %s1428_s18, 5   ;;  %s1678_s21 = smov %s1232_s22 }
 0x2c5   : > { %s1679_s22 = smov %s1236_s23  ;;  %s1680_s23 = smov %s1438_s15 }
 0x2c6   : > { %s1681_s24 = smov %s1428_s18  ;;  %27 = sbr.rel (!%p25_p5) target bundleno = 11 (0xb), region = 133 }
 0x2cd   :  { %676 = vsyncpa [#allocation3], 1 }
 0x2ce   :  { %678 = vsyncpa [#allocation3 + $0x1], 1 }
 0x2cf   :  { %679 = vsyncpa [#allocation6], 1 }
 0x2d0   :  { %680 = vsyncpa [#allocation9], 1 }
 0x2d1   :  { %681 = vsyncpa [#allocation4], 1 }
 0x2d2   :  { %683 = vsyncpa [#allocation4 + $0x1], 1 }
 0x2d3   :  { %684 = vsyncpa [#allocation12], 1 }
 0x2d4   :  { %686 = vsyncpa [#allocation12 + $0x1], 1 }

</bundles_post_ra>
